<compile_context>
chip_gen: v7x
topology: tpu7x:2x2x1
jax: 0.10.0
libtpu: 0.0.40
codegen_flags: <defaults>
</compile_context>

<pallas_src>
import functools

import jax
import jax.numpy as jnp
from jax.experimental import pallas as pl
from jax.experimental.pallas import tpu as pltpu


def _lk_encoder_kernel(TH, Wp, C, x_main_ref, x_halo_ref, w_ref, alpha_ref, o_ref):
    # x_main_ref: (1, C, TH*Wp)   padded rows [i*TH, i*TH+TH), flattened
    # x_halo_ref: (1, C, 8*Wp)    padded rows [i*TH+TH, i*TH+TH+8) (halo)
    # w_ref:      (Co, 25*C)      folded 5x5 weight, bf16, resident in VMEM
    # alpha_ref:  (1,) f32        PReLU slope (SMEM)
    # o_ref:      (1, Co, TH*Wp)  lane-dense output tile (full padded width)
    x = jnp.concatenate([x_main_ref[0], x_halo_ref[0]], axis=1)  # (C, (TH+8)*Wp)

    # im2col over the full padded width: tap (kh, kw) is a contiguous,
    # lane-shifted slice of the flattened rows.  Columns w' >= W per row are
    # garbage (wrapped reads) and are cropped by the wrapper.
    span = TH * Wp
    taps = []
    for kh in range(5):
        for kw in range(5):
            s = kh * Wp + kw
            taps.append(x[:, s:s + span])            # (C, TH*Wp), bf16
    slab = jnp.concatenate(taps, axis=0)             # (25*C, TH*Wp), bf16

    # single MXU matmul, K = 25*C, f32 accumulation
    acc = jnp.dot(w_ref[...], slab, preferred_element_type=jnp.float32)  # (Co, TH*Wp)

    # PReLU (single shared slope), f32, lane-dense
    alpha = alpha_ref[0]
    out = jnp.where(acc > 0, acc, alpha * acc)
    o_ref[0] = out.astype(o_ref.dtype)


def _choose_tile_h(H, C, Co, Wp):
    """Row tile TH: multiple of 8, divides H, modest VMEM, >=2 tiles if possible."""
    budget = 8 * 1024 * 1024

    def est(t):
        span = t * Wp
        slab = 25 * C * span * 2
        xwin = C * (t + 8) * Wp * 2
        io = 2 * (C * span + C * 8 * Wp) * 2 + 2 * Co * span * 4
        return slab + xwin + io + Co * span * 4

    cands = [t for t in range(8, H + 1, 8) if H % t == 0]
    if not cands:
        raise ValueError("H must be a multiple of 8 for the row tiling")
    fitting = [t for t in cands if est(t) <= budget] or [cands[0]]
    multi = [t for t in fitting if H // t >= 2]
    return max(multi) if multi else max(fitting)


def lk_encoder_forward(x_nchw, w3_oihw, w5_oihw, w1_oihw, alpha, tile_h=None):
    """x_nchw: (N, C, H, W) float32; weights in PyTorch OIHW. Returns (N, Co, H, W)."""
    N, C, H, W = x_nchw.shape
    Co = w3_oihw.shape[0]
    assert Co == C, "residual add requires in_channels == out_channels"
    assert H % 8 == 0, "H must be a multiple of 8 for the row tiling"

    Wp = ((W + 4 + 15) // 16) * 16            # padded width (>= W+4), lane friendly
    TH = tile_h if tile_h is not None else _choose_tile_h(H, C, Co, Wp)
    assert TH % 8 == 0 and H % TH == 0
    HT = H // TH
    Hp = H + 8                                 # 2 top pad + 2 bottom pad + 4 slack rows
    span = TH * Wp

    # ---- fold 3x3 + 5x5 + 1x1 convs + identity residual into ONE 5x5 weight ----
    w_eff = (w5_oihw
             + jnp.pad(w3_oihw, ((0, 0), (0, 0), (1, 1), (1, 1)))
             + jnp.pad(w1_oihw, ((0, 0), (0, 0), (2, 2), (2, 2))))
    w_eff = w_eff.at[:, :, 2, 2].add(jnp.eye(Co, C, dtype=w_eff.dtype))
    # (Co, C, 5, 5) -> (Co, 25*C) with column index (kh*5 + kw)*C + c
    w_mat = jnp.transpose(w_eff, (0, 2, 3, 1)).reshape(Co, 25 * C).astype(jnp.bfloat16)

    # ---- pad + flatten the input; stays NCHW, no transposes ----
    x_pad = jnp.pad(x_nchw, ((0, 0), (0, 0), (2, Hp - H - 2), (2, Wp - W - 2)))
    x_flat = x_pad.astype(jnp.bfloat16).reshape(N, C, Hp * Wp)

    alpha_arr = jnp.asarray(alpha, jnp.float32).reshape((1,))

    est = (25 * C * span * 2 + C * (TH + 8) * Wp * 2
           + 2 * (C * span + C * 8 * Wp) * 2 + 3 * Co * span * 4
           + Co * 25 * C * 2)
    vmem_limit = int(min(48 * 2**20, max(32 * 2**20, 6 * est)))

    kernel = functools.partial(_lk_encoder_kernel, TH, Wp, C)

    out_flat = pl.pallas_call(
        kernel,
        out_shape=jax.ShapeDtypeStruct((N, Co, H * Wp), x_nchw.dtype),
        grid=(N, HT),
        in_specs=[
            # main rows [i*TH, i*TH+TH) of this image (flattened H*Wp axis)
            pl.BlockSpec((1, C, span), lambda b, i: (b, 0, i)),
            # halo: next 8 rows (only the first 4 are real conv halo)
            pl.BlockSpec((1, C, 8 * Wp), lambda b, i: (b, 0, (i + 1) * (TH // 8))),
            # folded weight: whole array, constant index -> fetched once / resident
            pl.BlockSpec((Co, 25 * C), lambda b, i: (0, 0)),
            # PReLU slope scalar
            pl.BlockSpec(memory_space=pltpu.MemorySpace.SMEM),
        ],
        out_specs=pl.BlockSpec((1, Co, span), lambda b, i: (b, 0, i)),
        compiler_params=pltpu.CompilerParams(
            dimension_semantics=("parallel", "parallel"),
            vmem_limit_bytes=vmem_limit),
    )(x_flat, x_flat, w_mat, alpha_arr)

    # crop the padded-width halo columns and restore (N, Co, H, W) -- NCHW already
    return out_flat.reshape(N, Co, H, Wp)[:, :, :, :W]


def _reference_forward(x, w3, w5, w1, alpha):
    """Pure-JAX f32 reference (NCHW, OIHW) matching the PyTorch module."""
    dn = ("NCHW", "OIHW", "NCHW")
    conv = lambda w, p: jax.lax.conv_general_dilated(
        x, w, window_strides=(1, 1), padding=((p, p), (p, p)),
        dimension_numbers=dn)
    s = conv(w3, 1) + conv(w5, 2) + conv(w1, 0) + x
    return jnp.where(s > 0, s, alpha * s)


if __name__ == "__main__":
    N, C, H, W = 2, 4, 16, 16
    Co = C  # residual connection forces out_channels == in_channels

    key = jax.random.PRNGKey(0)
    kx, k3, k5, k1 = jax.random.split(key, 4)
    x = jax.random.normal(kx, (N, C, H, W), jnp.float32)
    # PyTorch Conv2d weight layout: OIHW
    w3 = 0.1 * jax.random.normal(k3, (Co, C, 3, 3), jnp.float32)
    w5 = 0.1 * jax.random.normal(k5, (Co, C, 5, 5), jnp.float32)
    w1 = 0.1 * jax.random.normal(k1, (Co, C, 1, 1), jnp.float32)
    alpha = jnp.float32(0.25)  # nn.PReLU() default init

    out = lk_encoder_forward(x, w3, w5, w1, alpha)
    out = jax.block_until_ready(out)

    ref = _reference_forward(x, w3, w5, w1, alpha)
    assert out.shape == (N, Co, H, W)
    # bf16 MXU inputs -> relaxed tolerance vs. the pure-f32 reference
    err = float(jnp.max(jnp.abs(out - ref)))
    assert jnp.allclose(out, ref, atol=5e-2, rtol=5e-2), f"max abs err {err}"

    print("KERNEL_OK")
</pallas_src>

<mosaic_0001>
module attributes {stable_mosaic.version = 11 : i64} {
  func.func @_lk_encoder_kernel(%arg0: i32, %arg1: i32, %arg2: memref<1x4x256xbf16, #tpu.memory_space<vmem>>, %arg3: memref<1x4x256xbf16, #tpu.memory_space<vmem>>, %arg4: memref<4x100xbf16, #tpu.memory_space<vmem>>, %arg5: memref<1xf32, #tpu.memory_space<smem>>, %arg6: memref<1x4x256xf32, #tpu.memory_space<vmem>>) attributes {dimension_semantics = [#tpu.dimension_semantics<parallel>, #tpu.dimension_semantics<parallel>], iteration_bounds = array<i64: 2, 2>, scalar_prefetch = 0 : i64, scratch_operands = 0 : i64, tpu.core_type = #tpu.core_type<tc>, window_params = [{transform_indices = @transform_0, window_bounds = array<i64: 1, 4, 256>}, {transform_indices = @transform_1, window_bounds = array<i64: 1, 4, 256>}, {pipeline_mode = #tpu.pipeline_mode<synchronous>, transform_indices = @transform_2, window_bounds = array<i64: 4, 100>}, {transform_indices = @transform_3, window_bounds = array<i64: 1>}, {transform_indices = @transform_4, window_bounds = array<i64: 1, 4, 256>}]} {
    %c0 = arith.constant 0 : index
    %c0_0 = arith.constant 0 : index
    %c0_1 = arith.constant 0 : index
    %0 = vector.load %arg2[%c0, %c0_0, %c0_1] : memref<1x4x256xbf16, #tpu.memory_space<vmem>>, vector<1x4x256xbf16>
    %1 = vector.shape_cast %0 : vector<1x4x256xbf16> to vector<4x256xbf16>
    %c0_2 = arith.constant 0 : index
    %c0_3 = arith.constant 0 : index
    %c0_4 = arith.constant 0 : index
    %2 = vector.load %arg3[%c0_2, %c0_3, %c0_4] : memref<1x4x256xbf16, #tpu.memory_space<vmem>>, vector<1x4x256xbf16>
    %3 = vector.shape_cast %2 : vector<1x4x256xbf16> to vector<4x256xbf16>
    %4 = tpu.concatenate %1, %3 in 1 : vector<4x256xbf16>, vector<4x256xbf16> -> vector<4x512xbf16>
    %5 = vector.extract_strided_slice %4 {offsets = [0, 0], sizes = [4, 256], strides = [1, 1]} : vector<4x512xbf16> to vector<4x256xbf16>
    %6 = vector.extract_strided_slice %4 {offsets = [0, 1], sizes = [4, 256], strides = [1, 1]} : vector<4x512xbf16> to vector<4x256xbf16>
    %7 = vector.extract_strided_slice %4 {offsets = [0, 2], sizes = [4, 256], strides = [1, 1]} : vector<4x512xbf16> to vector<4x256xbf16>
    %8 = vector.extract_strided_slice %4 {offsets = [0, 3], sizes = [4, 256], strides = [1, 1]} : vector<4x512xbf16> to vector<4x256xbf16>
    %9 = vector.extract_strided_slice %4 {offsets = [0, 4], sizes = [4, 256], strides = [1, 1]} : vector<4x512xbf16> to vector<4x256xbf16>
    %10 = vector.extract_strided_slice %4 {offsets = [0, 32], sizes = [4, 256], strides = [1, 1]} : vector<4x512xbf16> to vector<4x256xbf16>
    %11 = vector.extract_strided_slice %4 {offsets = [0, 33], sizes = [4, 256], strides = [1, 1]} : vector<4x512xbf16> to vector<4x256xbf16>
    %12 = vector.extract_strided_slice %4 {offsets = [0, 34], sizes = [4, 256], strides = [1, 1]} : vector<4x512xbf16> to vector<4x256xbf16>
    %13 = vector.extract_strided_slice %4 {offsets = [0, 35], sizes = [4, 256], strides = [1, 1]} : vector<4x512xbf16> to vector<4x256xbf16>
    %14 = vector.extract_strided_slice %4 {offsets = [0, 36], sizes = [4, 256], strides = [1, 1]} : vector<4x512xbf16> to vector<4x256xbf16>
    %15 = vector.extract_strided_slice %4 {offsets = [0, 64], sizes = [4, 256], strides = [1, 1]} : vector<4x512xbf16> to vector<4x256xbf16>
    %16 = vector.extract_strided_slice %4 {offsets = [0, 65], sizes = [4, 256], strides = [1, 1]} : vector<4x512xbf16> to vector<4x256xbf16>
    %17 = vector.extract_strided_slice %4 {offsets = [0, 66], sizes = [4, 256], strides = [1, 1]} : vector<4x512xbf16> to vector<4x256xbf16>
    %18 = vector.extract_strided_slice %4 {offsets = [0, 67], sizes = [4, 256], strides = [1, 1]} : vector<4x512xbf16> to vector<4x256xbf16>
    %19 = vector.extract_strided_slice %4 {offsets = [0, 68], sizes = [4, 256], strides = [1, 1]} : vector<4x512xbf16> to vector<4x256xbf16>
    %20 = vector.extract_strided_slice %4 {offsets = [0, 96], sizes = [4, 256], strides = [1, 1]} : vector<4x512xbf16> to vector<4x256xbf16>
    %21 = vector.extract_strided_slice %4 {offsets = [0, 97], sizes = [4, 256], strides = [1, 1]} : vector<4x512xbf16> to vector<4x256xbf16>
    %22 = vector.extract_strided_slice %4 {offsets = [0, 98], sizes = [4, 256], strides = [1, 1]} : vector<4x512xbf16> to vector<4x256xbf16>
    %23 = vector.extract_strided_slice %4 {offsets = [0, 99], sizes = [4, 256], strides = [1, 1]} : vector<4x512xbf16> to vector<4x256xbf16>
    %24 = vector.extract_strided_slice %4 {offsets = [0, 100], sizes = [4, 256], strides = [1, 1]} : vector<4x512xbf16> to vector<4x256xbf16>
    %25 = vector.extract_strided_slice %4 {offsets = [0, 128], sizes = [4, 256], strides = [1, 1]} : vector<4x512xbf16> to vector<4x256xbf16>
    %26 = vector.extract_strided_slice %4 {offsets = [0, 129], sizes = [4, 256], strides = [1, 1]} : vector<4x512xbf16> to vector<4x256xbf16>
    %27 = vector.extract_strided_slice %4 {offsets = [0, 130], sizes = [4, 256], strides = [1, 1]} : vector<4x512xbf16> to vector<4x256xbf16>
    %28 = vector.extract_strided_slice %4 {offsets = [0, 131], sizes = [4, 256], strides = [1, 1]} : vector<4x512xbf16> to vector<4x256xbf16>
    %29 = vector.extract_strided_slice %4 {offsets = [0, 132], sizes = [4, 256], strides = [1, 1]} : vector<4x512xbf16> to vector<4x256xbf16>
    %30 = tpu.concatenate %5, %6, %7, %8, %9, %10, %11, %12, %13, %14, %15, %16, %17, %18, %19, %20 in 0 : vector<4x256xbf16>, vector<4x256xbf16>, vector<4x256xbf16>, vector<4x256xbf16>, vector<4x256xbf16>, vector<4x256xbf16>, vector<4x256xbf16>, vector<4x256xbf16>, vector<4x256xbf16>, vector<4x256xbf16>, vector<4x256xbf16>, vector<4x256xbf16>, vector<4x256xbf16>, vector<4x256xbf16>, vector<4x256xbf16>, vector<4x256xbf16> -> vector<64x256xbf16>
    %31 = tpu.concatenate %21, %22, %23, %24, %25, %26, %27, %28, %29 in 0 : vector<4x256xbf16>, vector<4x256xbf16>, vector<4x256xbf16>, vector<4x256xbf16>, vector<4x256xbf16>, vector<4x256xbf16>, vector<4x256xbf16>, vector<4x256xbf16>, vector<4x256xbf16> -> vector<36x256xbf16>
    %32 = tpu.concatenate %30, %31 in 0 : vector<64x256xbf16>, vector<36x256xbf16> -> vector<100x256xbf16>
    %c0_5 = arith.constant 0 : index
    %c0_6 = arith.constant 0 : index
    %33 = vector.load %arg4[%c0_5, %c0_6] : memref<4x100xbf16, #tpu.memory_space<vmem>>, vector<4x100xbf16>
    %cst = arith.constant dense<0.000000e+00> : vector<4x256xf32>
    %34 = tpu.matmul %33, %32, %cst {dimension_numbers = #tpu.dot_dimension_numbers<[1], [0], [0], [1], [0, 0, 1, 1], [], []>} : vector<4x100xbf16>, vector<100x256xbf16>, vector<4x256xf32> -> vector<4x256xf32>
    %c0_7 = arith.constant 0 : index
    %35 = memref.load %arg5[%c0_7] : memref<1xf32, #tpu.memory_space<smem>>
    %cst_8 = arith.constant 0.000000e+00 : f32
    %36 = vector.broadcast %cst_8 : f32 to vector<4x256xf32>
    %37 = arith.cmpf ogt, %34, %36 : vector<4x256xf32>
    %38 = vector.broadcast %35 : f32 to vector<4x256xf32>
    %39 = arith.mulf %38, %34 : vector<4x256xf32>
    %40 = arith.select %37, %34, %39 : vector<4x256xi1>, vector<4x256xf32>
    %c0_9 = arith.constant 0 : index
    %c0_10 = arith.constant 0 : index
    %c0_11 = arith.constant 0 : index
    %41 = vector.load %arg6[%c0_9, %c0_10, %c0_11] : memref<1x4x256xf32, #tpu.memory_space<vmem>>, vector<1x4x256xf32>
    %42 = vector.shape_cast %41 : vector<1x4x256xf32> to vector<4x256xf32>
    %43 = vector.shape_cast %40 : vector<4x256xf32> to vector<1x4x256xf32>
    tpu.vector_store %arg6[%c0_9, %c0_10, %c0_11], %43 {strides = array<i32>} : memref<1x4x256xf32, #tpu.memory_space<vmem>>, vector<1x4x256xf32>,
    return
  }
  func.func @transform_0(%arg0: i32, %arg1: i32) -> (i32, i32, i32) {
    %c0_i32 = arith.constant 0 : i32
    %c0_i32_0 = arith.constant 0 : i32
    return %arg0, %c0_i32, %arg1 : i32, i32, i32
  }
  func.func @transform_1(%arg0: i32, %arg1: i32) -> (i32, i32, i32) {
    %c1_i32 = arith.constant 1 : i32
    %0 = arith.addi %arg1, %c1_i32 : i32
    %c1_i32_0 = arith.constant 1 : i32
    %1 = arith.muli %0, %c1_i32_0 : i32
    %c0_i32 = arith.constant 0 : i32
    %c0_i32_1 = arith.constant 0 : i32
    return %arg0, %c0_i32, %1 : i32, i32, i32
  }
  func.func @transform_2(%arg0: i32, %arg1: i32) -> (i32, i32) {
    %c0_i32 = arith.constant 0 : i32
    %c0_i32_0 = arith.constant 0 : i32
    %c0_i32_1 = arith.constant 0 : i32
    return %c0_i32, %c0_i32_0 : i32, i32
  }
  func.func @transform_3(%arg0: i32, %arg1: i32) -> i32 {
    %c0_i32 = arith.constant 0 : i32
    %c0_i32_0 = arith.constant 0 : i32
    return %c0_i32 : i32
  }
  func.func @transform_4(%arg0: i32, %arg1: i32) -> (i32, i32, i32) {
    %c0_i32 = arith.constant 0 : i32
    %c0_i32_0 = arith.constant 0 : i32
    return %arg0, %c0_i32, %arg1 : i32, i32, i32
  }
}

</mosaic_0001>

<bundles_post_ra>
// kernel: tpu_custom_call.1
= control target key start
LH: loop header
LB: loop body
LE: loop exit
PB: predicated region body
PF: predicated region fallthrough
CT: control target
= control target key end

     0   :  { %s1623_s0 = inlined_call_operand.hbm [shape: bf16[2,4,768], index: 0, kind: input, shape index: {}]   ;;  %s1624_s1 = inlined_call_operand.hbm [shape: bf16[2,4,768], index: 1, kind: input, shape index: {}]   ;;  %s1625_s2 = inlined_call_operand.vmem [shape: bf16[4,100], index: 2, kind: input, shape index: {}]   ;;  %s1626_s3 = inlined_call_operand.<no memory space> [shape: f32[1], index: 3, kind: input, shape index: {}]   ;;  %s1627_s4 = inlined_call_operand.hbm [shape: f32[2,4,512], index: 4, kind: output, shape index: {}]  }
   0x1   :  { %9 = sst [smem:[#allocation2]] %s1626_s3 }
   0x2   :  { %10 = vsyncpa [#allocation4], 0 }
   0x3   :  { %12 = vsyncpa [#allocation4 + $0x1], 0 }
   0x4   :  { %13 = vsyncpa [#allocation7], 0 }
   0x5   :  { %15 = vsyncpa [#allocation7 + $0x1], 0 }
   0x6   :  { %16 = vsyncpa [#allocation5], 0 }
   0x7   :  { %18 = vsyncpa [#allocation5 + $0x1], 0  ;;  %s1179_s17 = smov 0   ;;  %s1181_s18 = smov 0  }
   0x8   :  { %s1183_s19 = smov 0   ;;  %s1185_s20 = smov 0  }
   0x9   :  { %s1187_s21 = smov 0   ;;  %s1189_s22 = smov 0  }
   0xa   :  { %s1191_s23 = smov 0   ;;  %s1193_s3 = smov 0  }
   0xb   :  { %s1195_s24 = smov 0   ;;  %s1197_s25 = smov 0  }
   0xc   :  { %s1199_s26 = smov 0  }
   0xd LB: > { %1639 = sst [smem:[#allocation12_spill]] %s1120_s24  ;;  %s791_s27 = sadd.s32 4294967295, %s1128_s26   ;;  %s1128_s26 = sphi %s1199_s26, %s24_s26   ;;  %s1124_s25 = sphi %s1197_s25, %s1673_s25   ;;  %s1120_s24 = sphi %s1195_s24, %s1665_s24   ;;  %s1116_s3 = sphi %s1193_s3, %s1664_s3   ;;  %s1112_s23 = sphi %s1191_s23, %s1663_s23   ;;  %s1108_s22 = sphi %s1189_s22, %s1672_s22   ;;  %s1104_s21 = sphi %s1187_s21, %s1671_s21   ;;  %s1100_s20 = sphi %s1185_s20, %s1670_s20   ;;  %s1096_s19 = sphi %s1183_s19, %s1669_s19   ;;  %s1092_s18 = sphi %s1181_s18, %s1668_s18   ;;  %s1088_s17 = sphi %s1179_s17, %s1667_s17  }
   0xe   : > { %1640 = sst [smem:[#allocation13_spill]] %s1124_s25  ;;  %s792_s28 = sadd.s32 4294967294, %s1128_s26  }
   0xf   : > { %s33_s29 = sadd.s32 1, %s1120_s24  ;;  %s36_s30 = sadd.s32 1, %s1124_s25 }
  0x10   : > { %p34_p0 = scmp.ge.s32.totalorder %s33_s29, 2  ;;  %s45_s5 = sadd.s32 1, %s1108_s22 }
  0x11   : > { %p52_p1 = scmp.ne.s32.totalorder %s1108_s22, %s1104_s21  ;;  %p1634_p2 = scmp.eq.s32.totalorder %s1128_s26, 0 }
  0x12   : > { %s1242_s6 = scalar_select %p34_p0, 0, %s33_s29  }
  0x13   : > { %s1675_s30 = smov (!%p34_p0, %s36_s30), %s1124_s25  ;;  %p1252_p3 = por %p1634_p2, %p52_p1 }
  0x14   : > { %1641 = sst [smem:[#allocation14_spill]] %s1242_s6  ;;  %s41_s7 = ssub.s32 %s1120_s24, %s1242_s6 }
  0x15   : > { %p38_p4 = scmp.ge.s32.totalorder %s1675_s30, 2  ;;  %p58_p5 = scmp.ne.s32.totalorder %s1104_s21, %s1100_s20 }
  0x16   : > { %p1258_p6 = scmp.eq.s32.totalorder %s791_s27, 0  ;;  %s69_s10 = sadd.s32 1, %s1242_s6 }
  0x17   : > { %s1677_s30 = smov (%p38_p4, %s1675_s30), 0  ;;  %s71_s12 = ssub.s32 %s33_s29, %s69_s10 }
  0x18   : > { %s1643_s9 = scalar_select %p1258_p6, 1, 0 }
  0x19   : > { %1644 = sst [smem:[#allocation15_spill]] %s1677_s30  ;;  %p1270_p7 = por %p1258_p6, %p58_p5 }
  0x1a   : > { %s40_s13 = ssub.s32 %s1124_s25, %s1677_s30  ;;  %p156_p8 = scmp.eq.s32.totalorder %s791_s27, 3 }
  0x1b   : > { %s1645_s11 = scalar_select %p1270_p7, 1, 0 }
  0x1c   : > { %s42_s14 = sor.u32 %s41_s7, %s40_s13  ;;  %s72_s15 = sor.u32 %s71_s12, %s40_s13 }
  0x1d   : > { %p43_p9 = scmp.eq.s32.totalorder %s42_s14, 0  ;;  %p1276_p10 = scmp.eq.s32.totalorder %s72_s15, 0 }
  0x1e   : > { %p1283_p11 = por %p156_p8, %p52_p1  ;;  %p162_p12 = scmp.eq.s32.totalorder %s792_s28, 3 }
  0x1f   : > { %s1288_s29 = scalar_select %p43_p9, %s1108_s22, %s45_s5  }
  0x20   : > { %s1647_s6 = scalar_select %p1283_p11, 1, 0 }
  0x21   : > { %p1293_p13 = por %p162_p12, %p58_p5  ;;  %p1633_p0 = scmp.lt.s32.totalorder %s1128_s26, 4 }
  0x22   : > { %s188_s7 = sand.u32 1, %s1108_s22   ;;  %s796_s12 = sshll.u32 %s1120_s24, 1 }
  0x23   : > { %s1648_s27 = scalar_select %p1293_p13, 1, 0 }
  0x24   : > { %s795_s10 = sshll.u32 %s188_s7, 2  ;;  %s815_s13 = smul.u32 6, %s1124_s25 }
  0x25   : > { %s192_s14 = scalar_lea.vmem [#allocation3], %s795_s10  ;;  %p1307_p1 = pnand %p1633_p0, %p1252_p3 }
  0x26   : > { %s202_s15 = sshll.u32 %s192_s14, 4  ;;  %s1311_s5 = sadd.s32 %s815_s13, %s796_s12  ;;  %s1301_s15 = int_to_ptr.vmem [resolvable:$true] %s202_s15 }
  0x27   : > { %s1632_s30 = sshll.u32 %s1311_s5, 5  ;;  %s189_s8 = scalar_lea.sflag [#allocation4], %s188_s7 }
  0x28   : > { %s1320_s14 = scalar_lea.hbm %s1623_s0, %s1632_s30  ;;  %p943_p8 = pneg %p1307_p1 }
  0x29   : > { %s941_s24 = scalar_lea.hbm %s1320_s14, 64  ;;  %s946_s25 = scalar_lea.hbm %s1623_s0, 384 }
  0x2a   : > { %p942_p5 = scmp.ne.s32.totalorder %s1320_s14, %s941_s24  ;;  %p947_p0 = scmp.lt.u32.totalorder %s1320_s14, %s1623_s0 }
  0x2b   : > { %p948_p2 = scmp.lt.u32.totalorder %s946_s25, %s941_s24  ;;  %p950_p3 = scmp.lt.u32.totalorder %s941_s24, %s1320_s14 }
  0x2c   : > { %p944_p9 = pnand %p943_p8, %p942_p5 }
  0x2d   : > { %p949_p4 = por %p948_p2, %p947_p0 }
  0x2e   : > { %p945_p12 = pneg %p944_p9 }
  0x2f   : > { %p951_p13 = por %p950_p3, %p949_p4 }
  0x31   : > { %p952_p11 = pnand %p951_p13, %p945_p12 }
  0x33   : > { %955 = shalt.err (!%p952_p11)
}
  0x34   : > { %s956_s7 = scalar_lea.vmem %s1301_s15, 64  ;;  %s1130_s12 = smov [#allocation3]  }
  0x35   : > { %p957_p5 = scmp.ne.s32.totalorder %s1301_s15, %s956_s7  ;;  %s961_s13 = sshll.u32 %s1130_s12, 4  ;;  %s962_s13 = int_to_ptr.vmem [resolvable:$false] %s961_s13 }
  0x36   : > { %s963_s30 = scalar_lea.vmem %s962_s13, 128  ;;  %p964_p6 = scmp.lt.s32.totalorder %s1301_s15, %s962_s13 }
  0x37   : > { %p959_p9 = pnand %p957_p5, %p943_p8  ;;  %p965_p2 = scmp.lt.s32.totalorder %s963_s30, %s956_s7 }
  0x39   : > { %p960_p7 = pneg %p959_p9  ;;  %p966_p0 = por %p965_p2, %p964_p6 }
  0x3b   : > { %p967_p4 = pnand %p966_p0, %p960_p7 }
  0x3d   : > { %970 = shalt.err (!%p967_p4)
}
  0x3e   : > { %825 = dma.hbm_to_vmem [thread:$0]  (!%p1307_p1), %s1320_s14, 64, %s1301_s15, %s189_s8  }
  0x3f   : > { %p1650_p6 = scmp.lt.s32.totalorder %s1128_s26, 5  ;;  %p1651_p7 = scmp.ge.s32.totalorder %s1128_s26, 1 }
  0x40   : > { %s75_s28 = sadd.s32 1, %s1096_s19  ;;  %p82_p13 = scmp.ne.s32.totalorder %s1096_s19, %s1092_s18 }
  0x41   : > { %p1352_p11 = pnand %p1651_p7, %p1650_p6  ;;  %p88_p3 = scmp.ne.s32.totalorder %s1092_s18, %s1088_s17 }
  0x42   : > { %s1360_s25 = scalar_select %p1276_p10, %s1096_s19, %s75_s28  }
  0x43   : > { %s209_s10 = sand.u32 1, %s1096_s19   ;;  %s1653_s7 = sshll.u32 %s1311_s5, 5 }
  0x44   : > { %s719_s30 = scalar_lea.hbm %s1624_s1, %s1653_s7  ;;  %p1654_p8 = scmp.eq.s32.totalorder %s1128_s26, 0 }
  0x45   : > { %p1655_p12 = scmp.ne.s32.totalorder %s1643_s9, 0  ;;  %s798_s14 = sshll.u32 %s209_s10, 2 }
  0x46   : > { %p84_p1 = por %p82_p13, %p1654_p8  ;;  %s1380_s8 = scalar_lea.hbm %s719_s30, 64 }
  0x47   : > { %p1376_p5 = por %p88_p3, %p1655_p12  ;;  %s213_s17 = scalar_lea.vmem [#allocation6], %s798_s14 }
  0x48   : > { %s224_s16 = sshll.u32 %s213_s17, 4  ;;  %p1657_p10 = scmp.lt.s32.totalorder %s1128_s26, 4  ;;  %s1388_s16 = int_to_ptr.vmem [resolvable:$true] %s224_s16 }
  0x49   : > { %s1656_s15 = scalar_select %p1376_p5, 1, 0 }
  0x4a   : > { %p1384_p9 = pnand %p1657_p10, %p84_p1  ;;  %s210_s9 = scalar_lea.sflag [#allocation7], %s209_s10 }
  0x4b   : > { %s1001_s28 = scalar_lea.hbm %s719_s30, 128  ;;  %s976_s13 = scalar_lea.hbm %s1624_s1, 384 }
  0x4c   : > { %p972_p2 = scmp.ne.s32.totalorder %s1380_s8, %s1001_s28  ;;  %p973_p0 = pneg %p1384_p9 }
  0x4d   : > { %p977_p7 = scmp.lt.u32.totalorder %s1380_s8, %s1624_s1  ;;  %p978_p13 = scmp.lt.u32.totalorder %s976_s13, %s1001_s28 }
  0x4e   : > { %p974_p4 = pnand %p973_p0, %p972_p2  ;;  %p980_p8 = scmp.lt.u32.totalorder %s1001_s28, %s1380_s8 }
  0x4f   : > { %p979_p3 = por %p978_p13, %p977_p7 }
  0x50   : > { %p975_p6 = pneg %p974_p4 }
  0x51   : > { %p981_p1 = por %p980_p8, %p979_p3 }
  0x53   : > { %p982_p12 = pnand %p981_p1, %p975_p6 }
  0x55   : > { %985 = shalt.err (!%p982_p12)
}
  0x56   : > { %s986_s10 = scalar_lea.vmem %s1388_s16, 64  ;;  %s1131_s30 = smov [#allocation6]  }
  0x57   : > { %p987_p10 = scmp.ne.s32.totalorder %s1388_s16, %s986_s10  ;;  %s991_s7 = sshll.u32 %s1131_s30, 4  ;;  %s992_s7 = int_to_ptr.vmem [resolvable:$false] %s991_s7 }
  0x58   : > { %s993_s12 = scalar_lea.vmem %s992_s7, 128  ;;  %p994_p5 = scmp.lt.s32.totalorder %s1388_s16, %s992_s7 }
  0x59   : > { %p989_p2 = pnand %p987_p10, %p973_p0  ;;  %p995_p7 = scmp.lt.s32.totalorder %s993_s12, %s986_s10 }
  0x5b   : > { %p990_p4 = pneg %p989_p2  ;;  %p996_p13 = por %p995_p7, %p994_p5 }
  0x5d   : > { %p997_p3 = pnand %p996_p13, %p990_p4 }
  0x5f   : > { %1000 = shalt.err (!%p997_p3)
}
  0x60   : > { %828 = dma.hbm_to_vmem [thread:$0]  (!%p1384_p9), %s1380_s8, 64, %s1388_s16, %s210_s9  }
  0x61   : > { %233 = sbr.rel (%p1352_p11) target bundleno = 635 (0x27b), region = 36  ;;  %s1417_s28 = sand.u32 (!%p1352_p11), 1, %s1104_s21  }
  0x62   : > { %s802_s13 = sshll.u32 (!%p1352_p11), %s1417_s28, 2  ;;  %s236_s14 = scalar_lea.sflag (!%p1352_p11), [#allocation4], %s1417_s28 }
  0x63   : > { %s239_s17 = scalar_lea.vmem (!%p1352_p11), [#allocation3], %s802_s13  ;;  %p1659_p5 = scmp.ne.s32.totalorder (!%p1352_p11), %s1645_s11, 0 }
  0x68   : > { %1075 = dma.done.wait (%p1659_p5), %s236_s14, 64  }
  0x69   : > { %1077 = vsyncadd (%p1659_p5), %s236_s14, 4294967232  ;;  %s244_s8 = sand.u32 1, %s1092_s18   ;;  %p1660_p11 = scmp.ne.s32.totalorder %s1656_s15, 0 }
  0x6a   : > { %s803_s16 = sshll.u32 %s244_s8, 2  ;;  %s245_s24 = scalar_lea.sflag [#allocation7], %s244_s8 }
  0x6b   : > { %s248_s5 = scalar_lea.vmem [#allocation6], %s803_s16 }
  0x6c   : > { %1079 = dma.done.wait (%p1660_p11), %s245_s24, 64  }
  0x6d   : > { %1081 = vsyncadd (%p1660_p11), %s245_s24, 4294967232  ;;  %v1430_v0 = vld.sshfl [vmem:[%s248_s5] sm:$0x33 pattern:$0x76325410]  ;;  %s1132_s11 = smov 127  }
  0x6e   : > { %v1433_v1 = vrot.slane %v1430_v0, 6  ;;  %v1435_v2 = vld.sshfl [vmem:[%s239_s17] sm:$0x33 pattern:$0x76325410]  ;;  %v1442_v4 = vrot.slane %v1430_v0, 4  ;;  %v302_v11 = vcombine.high %v1430_v0, %v1430_v0 }
  0x6f   : > { %v1438_v3 = vrot.slane %v1435_v2, 6  ;;  %v1447_v5 = vcombine.high %v1435_v2, %v1435_v2  ;;  %s1133_s15 = smov 126   ;;  %v315_v7 = vrot.slane %v1435_v2, 4  ;;  %v329_v9 = vrot.slane %v1430_v0, 2  ;;  %s1134_s9 = smov 125  }
  0x70   : > { %310 = vrot.lane.b32.xlu0 %v1433_v1, %s1132_s11  ;;  %v327_v10 = vrot.slane %v1435_v2, 2  ;;  %s1135_s10 = smov 96   ;;  %s1136_s30 = smov 97   ;;  %v520_v12 = vrot.slane %v302_v11, 6  ;;  %v528_v13 = vrot.slane %v302_v11, 2  ;;  %vm312_vm0 = vcmask 1039360  }
  0x71   : > { %306 = vrot.lane.b32.xlu1 %v1438_v3, %s1132_s11  ;;  %v304_v6 = vrot.slane %v1447_v5, 6  ;;  %v328_v8 = vrot.slane %v1447_v5, 2  ;;  %s1137_s7 = smov 95   ;;  %s1138_s12 = smov 94   ;;  %vm447_vm1 = vcmask 1041408   ;;  %vm454_vm2 = vcmask 1043456  }
  0x72   : > { %s1139_s13 = smov 93   ;;  %s1140_s14 = smov 124   ;;  %vm324_vm3 = vcmask 1031168   ;;  %vm336_vm4 = vcmask 1022976   ;;  %vm459_vm5 = vcmask 1045504   ;;  %vm518_vm6 = vcmask 793600  }
  0x73   : > { %s1141_s17 = smov 92   ;;  %s1142_s8 = smov 64   ;;  %vm363_vm7 = vcmask 777216   ;;  %vm354_vm8 = vcmask 785408   ;;  %vm372_vm9 = vcmask 769024   ;;  %vm381_vm10 = vcmask 760832  }
  0x74   : > { %322 = vrot.lane.b32.xlu0 %v1442_v4, %s1133_s15  ;;  %s1143_s16 = smov 63   ;;  %s1144_s24 = smov 62   ;;  %vm345_vm11 = vcmask 1014784   ;;  %vm390_vm12 = vcmask 752640   ;;  %vm399_vm13 = vcmask 523264   ;;  %vm408_vm14 = vcmask 515072  }
  0x75   : > { %320 = vrot.lane.b32.xlu1 %v1447_v5, %s1133_s15  ;;  %s1145_s5 = smov 61   ;;  %vm417_vm15 = vcmask 506880   ;;  %p1661_p0 = scmp.ne.s32.totalorder %s1647_s6, 0 }
  0x78   : > { %308 = vrot.lane.b32.xlu0 %v304_v6, %s1132_s11  ;;  %s1146_s11 = smov 60  }
  0x79   : > { %318 = vrot.lane.b32.xlu1 %v315_v7, %s1133_s15  ;;  %s1147_s15 = smov 32  }
  0x7c   : > { %332 = vrot.lane.b32.xlu0 %v328_v8, %s1134_s9 }
  0x7d   : > { %334 = vrot.lane.b32.xlu1 %v329_v9, %s1134_s9 }
  0x80   : > { %330 = vrot.lane.b32.xlu0 %v327_v10, %s1134_s9  ;;  %s1148_s9 = smov 31  }
  0x81   : > { %350 = vrot.lane.b32.xlu1 %v304_v6, %s1135_s10 }
  0x84   : > { %352 = vrot.lane.b32.xlu0 %v1433_v1, %s1135_s10 }
  0x85   : > { %514 = vrot.lane.b32.xlu1 %v1447_v5, %s1136_s30 }
  0x88   : > { %516 = vrot.lane.b32.xlu0 %v1430_v0, %s1136_s30 }
  0x89   : > { %521 = vrot.lane.b32.xlu1 %v520_v12, %s1135_s10 }
  0x8c   : > { %359 = vrot.lane.b32.xlu0 %v1447_v5, %s1137_s7 }
  0x8d   : > { %361 = vrot.lane.b32.xlu1 %v1442_v4, %s1137_s7 }
  0x90   : > { %525 = vrot.lane.b32.xlu0 %v302_v11, %s1137_s7 }
  0x91   : > { %368 = vrot.lane.b32.xlu1 %v328_v8, %s1138_s12 }
  0x94   : > { %370 = vrot.lane.b32.xlu0 %v329_v9, %s1138_s12 }
  0x95   : > { %529 = vrot.lane.b32.xlu1 %v528_v13, %s1138_s12 }
  0x98   : > { %377 = vrot.lane.b32.xlu0 %v1447_v5, %s1139_s13 }
  0x99   : > { %379 = vrot.lane.b32.xlu1 %v1430_v0, %s1139_s13 }
  0x9c   : > { %532 = vrot.lane.b32.xlu0 %v302_v11, %s1139_s13 }
  0x9d   : > { %341 = vrot.lane.b32.xlu1 %v1447_v5, %s1140_s14 }
  0xa0   : > { %343 = vrot.lane.b32.xlu0 %v1430_v0, %s1140_s14 }
  0xa1   : > { %339 = vrot.lane.b32.xlu1 %v1435_v2, %s1140_s14  ;;  %s811_s14 = sshll.u32 %s1116_s3, 2 }
  0xa4   : > { %348 = vrot.lane.b32.xlu0 %v1438_v3, %s1135_s10 }
  0xa5   : > { %357 = vrot.lane.b32.xlu1 %v315_v7, %s1137_s7  ;;  %s647_s7 = sld [smem:[#allocation2]] }
  0xa8   : > { %366 = vrot.lane.b32.xlu0 %v327_v10, %s1138_s12  ;;  %s804_s12 = sshll.u32 %s1417_s28, 3 }
  0xa9   : > { %386 = vrot.lane.b32.xlu1 %v304_v6, %s1141_s17 }
  0xac   : > { %388 = vrot.lane.b32.xlu0 %v1433_v1, %s1141_s17 }
  0xad   : > { %375 = vrot.lane.b32.xlu1 %v1435_v2, %s1139_s13  ;;  %s810_s13 = sshll.u32 %s1112_s23, 1 }
  0xb0   : > { %384 = vrot.lane.b32.xlu0 %v1438_v3, %s1141_s17  ;;  %s673_s17 = sadd.s32 %s811_s14, %s810_s13 }
  0xb1   : > { %395 = vrot.lane.b32.xlu1 %v1447_v5, %s1142_s8 }
  0xb4   : > { %397 = vrot.lane.b32.xlu0 %v1442_v4, %s1142_s8 }
  0xb5   : > { %393 = vrot.lane.b32.xlu1 %v315_v7, %s1142_s8  ;;  %s812_s8 = sshll.u32 %s673_s17, 6 }
  0xb8   : > { %404 = vrot.lane.b32.xlu0 %v328_v8, %s1143_s16 }
  0xb9   : > { %406 = vrot.lane.b32.xlu1 %v329_v9, %s1143_s16 }
  0xbc   : > { %402 = vrot.lane.b32.xlu0 %v327_v10, %s1143_s16  ;;  %s277_s16 = scalar_lea.vmem [#allocation8], %s804_s12 }
  0xbd   : > { %413 = vrot.lane.b32.xlu1 %v1447_v5, %s1144_s24 }
  0xc0   : > { %415 = vrot.lane.b32.xlu0 %v1430_v0, %s1144_s24 }
  0xc1   : > { %422 = vrot.lane.b32.xlu1 %v304_v6, %s1145_s5 }
  0xc4   : > { %424 = vrot.lane.b32.xlu0 %v1433_v1, %s1145_s5  ;;  %v1149_v1 = vmov 0  }
  0xc5   : > { %411 = vrot.lane.b32.xlu1 %v1435_v2, %s1144_s24  ;;  %638 = vmatprep.mubr.bf16.mxu0 %v1149_v1  ;;  %s677_s24 = sshll.u32 %s277_s16, 4  ;;  %s1562_s24 = int_to_ptr.vmem [resolvable:$true] %s677_s24 }
  0xc8   : > { %420 = vrot.lane.b32.xlu0 %v1438_v3, %s1145_s5  ;;  %s1560_s5 = scalar_lea.hbm %s1627_s4, %s812_s8 }
  0xc9   : > { %431 = vrot.lane.b32.xlu1 %v1447_v5, %s1146_s11 }
  0xcc   : > { %433 = vrot.lane.b32.xlu0 %v1442_v4, %s1146_s11 }
  0xcd   : > { %429 = vrot.lane.b32.xlu1 %v315_v7, %s1146_s11  ;;  %s661_s11 = scalar_lea.sflag [#allocation5], %s1417_s28 }
  0xd0   : > { %440 = vrot.lane.b32.xlu0 %v328_v8, %s1147_s15 }
  0xd1   : > { %442 = vrot.lane.b32.xlu1 %v329_v9, %s1147_s15 }
  0xd4   : > { %438 = vrot.lane.b32.xlu0 %v327_v10, %s1147_s15  ;;  %s1002_s15 = scalar_lea.vmem %s1562_s24, 128 }
  0xd5   : > { %p1003_p9 = scmp.ne.s32.totalorder %s1562_s24, %s1002_s15 }
  0xd7   : > { %p1004_p6 = pnand %p1003_p9, %p1661_p0 }
  0xd9   : > { %p1005_p8 = pneg %p1004_p6 }
  0xe2   : > { %v311_v14 = vpop.permute.xlu0 %310 }
  0xe3   : > { %v307_v15 = vpop.permute.xlu1 %306  ;;  %v537_v23 = vsel %vm447_vm1, %v1430_v0, %v311_v14 }
  0xe6   : > { %v323_v16 = vpop.permute.xlu0 %322 }
  0xe7   : > { %v321_v17 = vpop.permute.xlu1 %320  ;;  %v539_v25 = vsel %vm454_vm2, %v537_v23, %v323_v16 }
  0xe8   : > { %v326_v26 = vsel %vm324_vm3, %v321_v17, %v323_v16 }
  0xea   : > { %v309_v18 = vpop.permute.xlu0 %308 }
  0xeb   : > { %v319_v19 = vpop.permute.xlu1 %318  ;;  %v314_v20 = vsel %vm312_vm0, %v309_v18, %v311_v14  ;;  %v313_v21 = vsel %vm312_vm0, %v307_v15, %v309_v18  ;;  %vm426_vm0 = vcmask 498688  }
  0xec   : > { %v453_v22 = vsel %vm447_vm1, %v1447_v5, %v314_v20  ;;  %v325_v27 = vsel %vm324_vm3, %v319_v19, %v321_v17  ;;  %v450_v29 = vsel %vm447_vm1, %v1435_v2, %v313_v21  ;;  %vm435_vm3 = vcmask 490496  }
  0xed   : > { %v458_v32 = vsel %vm454_vm2, %v453_v22, %v326_v26  ;;  %v456_v37 = vsel %vm454_vm2, %v450_v29, %v325_v27 }
  0xee   : > { %v333_v24 = vpop.permute.xlu0 %332 }
  0xef   : > { %v335_v28 = vpop.permute.xlu1 %334 }
  0xf0   : > { %v338_v30 = vsel %vm336_vm4, %v333_v24, %v335_v28  ;;  %v541_v31 = vsel %vm459_vm5, %v539_v25, %v335_v28 }
  0xf1   : > { %570 = vrot.lane.b32.xlu0 %v541_v31, %s1148_s9  ;;  %v464_v33 = vsel %vm459_vm5, %v458_v32, %v338_v30 }
  0xf2   : > { %606 = vmatprep.subr.bf16.mxu0 %v464_v33  ;;  %v331_v34 = vpop.permute.xlu0 %330 }
  0xf3   : > { %v351_v35 = vpop.permute.xlu1 %350  ;;  %v337_v36 = vsel %vm336_vm4, %v331_v34, %v333_v24  ;;  %vm444_vm4 = vcmask 261120  }
  0xf4   : > { %v461_v38 = vsel %vm459_vm5, %v456_v37, %v337_v36 }
  0xf5   : > { %607 = vmatpush1.bf16.msra.mxu0 %v461_v38 }
  0xf6   : > { %v353_v39 = vpop.permute.xlu0 %352 }
  0xf7   : > { %v515_v40 = vpop.permute.xlu1 %514  ;;  %v356_v52 = vsel %vm354_vm8, %v351_v35, %v353_v39 }
  0xf8   : > { %v544_v45 = vsel %vm447_vm1, %v515_v40, %v351_v35 }
  0xfa   : > { %v517_v41 = vpop.permute.xlu0 %516 }
  0xfb   : > { %v522_v42 = vpop.permute.xlu1 %521  ;;  %v519_v47 = vsel %vm518_vm6, %v515_v40, %v517_v41  ;;  %vm584_vm6 = vcmask 252928  }
  0xfc   : > { %v546_v53 = vsel %vm447_vm1, %v519_v47, %v356_v52  ;;  %v523_v0 = vsel %vm354_vm8, %v353_v39, %v522_v42 }
  0xfd   : > { %v549_v7 = vsel %vm447_vm1, %v517_v41, %v523_v0 }
  0xfe   : > { %v360_v43 = vpop.permute.xlu0 %359 }
  0xff   : > { %v362_v44 = vpop.permute.xlu1 %361  ;;  %v551_v48 = vsel %vm454_vm2, %v544_v45, %v360_v43 }
 0x100   : > { %v365_v50 = vsel %vm363_vm7, %v360_v43, %v362_v44 }
 0x101   : > { %v552_v57 = vsel %vm454_vm2, %v546_v53, %v365_v50 }
 0x102   : > { %v526_v46 = vpop.permute.xlu0 %525 }
 0x103   : > { %v369_v49 = vpop.permute.xlu1 %368  ;;  %v527_v2 = vsel %vm363_vm7, %v362_v44, %v526_v46 }
 0x104   : > { %v556_v51 = vsel %vm459_vm5, %v551_v48, %v369_v49  ;;  %v554_v10 = vsel %vm454_vm2, %v549_v7, %v527_v2 }
 0x105   : > { %572 = vrot.lane.b32.xlu0 %v556_v51, %s1148_s9 }
 0x106   : > { %v371_v54 = vpop.permute.xlu0 %370 }
 0x107   : > { %v530_v55 = vpop.permute.xlu1 %529  ;;  %v374_v56 = vsel %vm372_vm9, %v369_v49, %v371_v54 }
 0x108   : > { %v557_v58 = vsel %vm459_vm5, %v552_v57, %v374_v56  ;;  %v531_v4 = vsel %vm372_vm9, %v371_v54, %v530_v55 }
 0x109   : > { %574 = vrot.lane.b32.xlu0 %v557_v58, %s1148_s9  ;;  %v559_v13 = vsel %vm459_vm5, %v554_v10, %v531_v4 }
 0x10a   : > { %v378_v59 = vpop.permute.xlu0 %377 }
 0x10b   : > { %v380_v60 = vpop.permute.xlu1 %379  ;;  %578 = vrot.lane.b32.xlu1 %v378_v59, %s1148_s9 }
 0x10c   : > { %v383_v61 = vsel %vm381_vm10, %v378_v59, %v380_v60 }
 0x10d   : > { %580 = vrot.lane.b32.xlu0 %v383_v61, %s1148_s9 }
 0x10e   : > { %v533_v62 = vpop.permute.xlu0 %532 }
 0x10f   : > { %v342_v63 = vpop.permute.xlu1 %341  ;;  %568 = vrot.lane.b32.xlu1 %v464_v33, %s1148_s9  ;;  %v534_v19 = vsel %vm381_vm10, %v380_v60, %v533_v62 }
 0x112   : > { %v344_v3 = vpop.permute.xlu0 %343 }
 0x113   : > { %v340_v5 = vpop.permute.xlu1 %339  ;;  %v347_v6 = vsel %vm345_vm11, %v342_v63, %v344_v3  ;;  %566 = vrot.lane.b32.xlu1 %v461_v38, %s1148_s9 }
 0x114   : > { %v471_v8 = vsel %vm447_vm1, %v347_v6, %v356_v52  ;;  %v346_v9 = vsel %vm345_vm11, %v340_v5, %v342_v63 }
 0x115   : > { %v475_v11 = vsel %vm454_vm2, %v471_v8, %v365_v50 }
 0x116   : > { %v349_v12 = vpop.permute.xlu0 %348  ;;  %v480_v14 = vsel %vm459_vm5, %v475_v11, %v374_v56 }
 0x117   : > { %v358_v15 = vpop.permute.xlu1 %357  ;;  %v355_v16 = vsel %vm354_vm8, %v349_v12, %v351_v35  ;;  %576 = vrot.lane.b32.xlu1 %v559_v13, %s1148_s9  ;;  %608 = vmatprep.subr.bf16.mxu0 %v480_v14 }
 0x118   : > { %v364_v17 = vsel %vm363_vm7, %v358_v15, %v360_v43  ;;  %v468_v18 = vsel %vm447_vm1, %v346_v9, %v355_v16 }
 0x119   : > { %v473_v23 = vsel %vm454_vm2, %v468_v18, %v364_v17 }
 0x11a   : > { %v367_v20 = vpop.permute.xlu0 %366 }
 0x11b   : > { %v387_v21 = vpop.permute.xlu1 %386  ;;  %v373_v22 = vsel %vm372_vm9, %v367_v20, %v369_v49  ;;  %582 = vrot.lane.b32.xlu1 %v534_v19, %s1148_s9  ;;  %s1150_s9 = smov [#allocation8]  }
 0x11c   : > { %v477_v24 = vsel %vm459_vm5, %v473_v23, %v373_v22  ;;  %s1006_s10 = sshll.u32 %s1150_s9, 4  ;;  %s1007_s10 = int_to_ptr.vmem [resolvable:$false] %s1006_s10 }
 0x11d   : > { %609 = vmatpush1.bf16.msra.mxu0 %v477_v24  ;;  %s1008_s30 = scalar_lea.vmem %s1007_s10, 256  ;;  %p1009_p1 = scmp.lt.s32.totalorder %s1562_s24, %s1007_s10 }
 0x11e   : > { %v389_v25 = vpop.permute.xlu0 %388  ;;  %p1010_p12 = scmp.lt.s32.totalorder %s1008_s30, %s1002_s15 }
 0x11f   : > { %v376_v26 = vpop.permute.xlu1 %375  ;;  %v392_v31 = vsel %vm390_vm12, %v387_v21, %v389_v25  ;;  %v595_v25 = vld [vmem:[%s1625_s2] sm:$0x3] }
 0x120   : > { %v487_v34 = vsel %vm447_vm1, %v383_v61, %v392_v31  ;;  %v382_v40 = vsel %vm381_vm10, %v376_v26, %v378_v59  ;;  %v650_v26 = vstv %s647_s7  ;;  %p1011_p10 = por %p1010_p12, %p1009_p1 }
 0x122   : > { %v385_v27 = vpop.permute.xlu0 %384  ;;  %p1012_p2 = pnand %p1011_p10, %p1005_p8 }
 0x123   : > { %v396_v28 = vpop.permute.xlu1 %395  ;;  %v391_v35 = vsel %vm390_vm12, %v385_v27, %v387_v21 }
 0x124   : > { %v484_v42 = vsel %vm447_vm1, %v382_v40, %v391_v35 }
 0x126   : > { %v398_v29 = vpop.permute.xlu0 %397 }
 0x127   : > { %v394_v30 = vpop.permute.xlu1 %393  ;;  %v401_v32 = vsel %vm399_vm13, %v396_v28, %v398_v29 }
 0x128   : > { %v400_v37 = vsel %vm399_vm13, %v394_v30, %v396_v28  ;;  %v491_v39 = vsel %vm454_vm2, %v487_v34, %v401_v32 }
 0x129   : > { %v489_v45 = vsel %vm454_vm2, %v484_v42, %v400_v37 }
 0x12a   : > { %v405_v33 = vpop.permute.xlu0 %404 }
 0x12b   : > { %v407_v36 = vpop.permute.xlu1 %406 }
 0x12c   : > { %v410_v38 = vsel %vm408_vm14, %v405_v33, %v407_v36 }
 0x12d   : > { %v496_v41 = vsel %vm459_vm5, %v491_v39, %v410_v38 }
 0x12e   : > { %610 = vmatprep.subr.bf16.mxu0 %v496_v41  ;;  %v403_v43 = vpop.permute.xlu0 %402 }
 0x12f   : > { %v409_v44 = vsel %vm408_vm14, %v403_v43, %v405_v33  ;;  %v414_v46 = vpop.permute.xlu1 %413 }
 0x130   : > { %v493_v47 = vsel %vm459_vm5, %v489_v45, %v409_v44 }
 0x131   : > { %611 = vmatpush1.bf16.msra.mxu0 %v493_v47 }
 0x132   : > { %v416_v48 = vpop.permute.xlu0 %415 }
 0x133   : > { %v423_v49 = vpop.permute.xlu1 %422  ;;  %v419_v54 = vsel %vm417_vm15, %v414_v46, %v416_v48 }
 0x136   : > { %v425_v50 = vpop.permute.xlu0 %424 }
 0x137   : > { %v412_v51 = vpop.permute.xlu1 %411  ;;  %v428_v55 = vsel %vm426_vm0, %v423_v49, %v425_v50 }
 0x138   : > { %v503_v58 = vsel %vm447_vm1, %v419_v54, %v428_v55  ;;  %v418_v59 = vsel %vm417_vm15, %v412_v51, %v414_v46 }
 0x13a   : > { %v421_v52 = vpop.permute.xlu0 %420 }
 0x13b   : > { %v432_v53 = vpop.permute.xlu1 %431  ;;  %v427_v57 = vsel %vm426_vm0, %v421_v52, %v423_v49 }
 0x13c   : > { %v500_v62 = vsel %vm447_vm1, %v418_v59, %v427_v57 }
 0x13e   : > { %v434_v56 = vpop.permute.xlu0 %433 }
 0x13f   : > { %v437_v60 = vsel %vm435_vm3, %v432_v53, %v434_v56  ;;  %v430_v61 = vpop.permute.xlu1 %429 }
 0x140   : > { %v436_v0 = vsel %vm435_vm3, %v430_v61, %v432_v53  ;;  %v507_v1 = vsel %vm454_vm2, %v503_v58, %v437_v60 }
 0x141   : > { %v505_v5 = vsel %vm454_vm2, %v500_v62, %v436_v0  ;;  %vm596_vm2 = vcmask 818176  }
 0x142   : > { %v441_v63 = vpop.permute.xlu0 %440 }
 0x143   : > { %v443_v2 = vpop.permute.xlu1 %442 }
 0x144   : > { %v446_v3 = vsel %vm444_vm4, %v441_v63, %v443_v2 }
 0x145   : > { %v512_v4 = vsel %vm459_vm5, %v507_v1, %v446_v3 }
 0x146   : > { %v439_v6 = vpop.permute.xlu0 %438  ;;  %612 = vmatprep.subr.bf16.mxu0 %v512_v4 }
 0x147   : > { %v445_v7 = vsel %vm444_vm4, %v439_v6, %v441_v63 }
 0x148   : > { %v509_v8 = vsel %vm459_vm5, %v505_v5, %v445_v7 }
 0x149   : > { %613 = vmatpush1.bf16.msra.mxu0 %v509_v8 }
 0x163   : > { %v571_v9 = vpop.permute.xlu0 %570 }
 0x177   : > { %v573_v10 = vpop.permute.xlu0 %572 }
 0x17b   : > { %v575_v14 = vpop.permute.xlu0 %574 }
 0x17c   : > { %v587_v20 = vsel %vm584_vm6, %v573_v10, %v575_v14 }
 0x17d   : > { %v579_v11 = vpop.permute.xlu1 %578 }
 0x17f   : > { %v581_v17 = vpop.permute.xlu0 %580 }
 0x180   : > { %v589_v21 = vsel %vm584_vm6, %v579_v11, %v581_v17 }
 0x181   : > { %v569_v12 = vpop.permute.xlu1 %568  ;;  %v601_v24 = vsel %vm447_vm1, %v589_v21, 0 }
 0x182   : > { %v586_v13 = vsel %vm584_vm6, %v569_v12, %v571_v9 }
 0x183   : > { %614 = vmatprep.subr.bf16.mxu0 %v586_v13 }
 0x185   : > { %v567_v15 = vpop.permute.xlu1 %566 }
 0x186   : > { %v585_v16 = vsel %vm584_vm6, %v567_v15, %v569_v12 }
 0x187   : > { %615 = vmatpush1.bf16.msra.mxu0 %v585_v16 }
 0x189   : > { %v577_v18 = vpop.permute.xlu1 %576 }
 0x18a   : > { %v588_v19 = vsel %vm584_vm6, %v575_v14, %v577_v18 }
 0x18b   : > { %616 = vmatprep.subr.bf16.mxu0 %v588_v19 }
 0x18c   : > { %617 = vmatpush1.bf16.msra.mxu0 %v587_v20 }
 0x18d   : > { %v583_v22 = vpop.permute.xlu1 %582 }
 0x18e   : > { %v590_v23 = vsel %vm584_vm6, %v581_v17, %v583_v22 }
 0x18f   : > { %807 = vmatprep.subr.msk.bf16.mxu0 %vm447_vm1, %v590_v23 }
 0x190   : > { %619 = vmatpush1.bf16.msra.mxu0 %v601_v24 }
 0x193   : > { %808 = vmatmul.mubr.msk.bf16.vlgmr.msra.gmra.mrb[0].mxu0 %vm596_vm2, %v595_v25 }
 0x266   : > { %v640_v27 = vpop.f32.mrb[0].mxu0 }
 0x267   : > { %vm648_vm5 = vcmp.gt.f32.partialorder %v640_v27, 0.0  ;;  %v651_v28 = vmul.f32 %v650_v26, %v640_v27  ;;  %v642_v29 = vpop.f32.mrb[1].mxu0 }
 0x268   : > { %vm649_vm7 = vcmp.gt.f32.partialorder %v642_v29, 0.0  ;;  %v652_v30 = vmul.f32 %v650_v26, %v642_v29  ;;  %v644_v31 = vpop.f32.mrb[2].mxu0 }
 0x269   : > { %v653_v32 = vsel %vm648_vm5, %v640_v27, %v651_v28  ;;  %v645_v33 = vpop.f32.mrb[3].mxu0 }
 0x26a   : > { %v654_v34 = vsel %vm649_vm7, %v642_v29, %v652_v30 }
 0x26b   : > { %v657_v35 = vcombine.low %v653_v32, %v654_v34 }
 0x26d   : > { %659 = vst [vmem:[%s277_s16] sm:$0xff] %v657_v35 }
 0x26e   : > { %1015 = shalt.err (!%p1012_p2)
}
 0x26f   : > { %s1016_s28 = scalar_lea.hbm %s1560_s5, 128  ;;  %s1020_s13 = scalar_lea.hbm %s1627_s4, 512 }
 0x270   : > { %p1017_p4 = scmp.ne.s32.totalorder %s1560_s5, %s1016_s28  ;;  %p1021_p3 = scmp.lt.u32.totalorder %s1560_s5, %s1627_s4 }
 0x271   : > { %p1022_p5 = scmp.lt.u32.totalorder %s1020_s13, %s1016_s28  ;;  %p1024_p9 = scmp.lt.u32.totalorder %s1016_s28, %s1560_s5 }
 0x272   : > { %p1018_p7 = pnand %p1017_p4, %p1661_p0 }
 0x273   : > { %p1023_p11 = por %p1022_p5, %p1021_p3 }
 0x274   : > { %p1019_p13 = pneg %p1018_p7 }
 0x275   : > { %p1025_p6 = por %p1024_p9, %p1023_p11 }
 0x277   : > { %p1026_p8 = pnand %p1025_p6, %p1019_p13 }
 0x279   : > { %1029 = shalt.err (!%p1026_p8)
}
 0x27a   : > { %820 = dma.vmem_to_hbm [thread:$0]  (%p1661_p0), %s1562_s24, 128, %s1560_s5, %s661_s11  }
 0x27b PF: > { %p834_p1 = scmp.ge.s32.totalorder %s1128_s26, 2  ;;  %s689_s8 = sand.u32 1, %s1100_s20  }
 0x27c   : > { %p1662_p12 = scmp.ne.s32.totalorder %s1648_s27, 0  ;;  %s690_s16 = scalar_lea.sflag [#allocation5], %s689_s8 }
 0x27e   : > { %p830_p10 = pnand %p834_p1, %p1662_p12 }
 0x280   : > { %1083 = dma.done.wait (!%p830_p10), %s690_s16, 128  }
 0x281   : > { %1085 = vsyncadd (!%p830_p10), %s690_s16, 4294967168  ;;  %s24_s26 = sadd.s32 1, %s1128_s26   ;;  %s1663_s23 = sld [smem:[#allocation12_spill]] }
 0x282   : > { %p21_p2 = scmp.ge.s32.totalorder %s24_s26, 6   ;;  %s1664_s3 = sld [smem:[#allocation13_spill]] }
 0x283   : > { %s1665_s24 = sld [smem:[#allocation14_spill]]  ;;  %s1666_s6 = sld [smem:[#allocation15_spill]] }
 0x284   : > { %s1667_s17 = smov %s1092_s18  ;;  %s1668_s18 = smov %s1096_s19 }
 0x285   : > { %s1669_s19 = smov %s1360_s25  ;;  %s1670_s20 = smov %s1104_s21 }
 0x286   : > { %s1671_s21 = smov %s1108_s22  ;;  %s1672_s22 = smov %s1288_s29 }
 0x287   :  { %23 = sbr.rel (!%p21_p2) target bundleno = 13 (0xd), region = 94 }
 0x289   : > { %s1673_s25 = smov %s1666_s6 }
 0x28e   :  { %695 = vsyncpa [#allocation4], 1 }
 0x28f   :  { %697 = vsyncpa [#allocation4 + $0x1], 1 }
 0x290   :  { %698 = vsyncpa [#allocation7], 1 }
 0x291   :  { %700 = vsyncpa [#allocation7 + $0x1], 1 }
 0x292   :  { %701 = vsyncpa [#allocation5], 1 }
 0x293   :  { %703 = vsyncpa [#allocation5 + $0x1], 1 }

</bundles_post_ra>
